<compile_context>
chip_gen: v7x
topology: tpu7x:2x2x1
jax: 0.10.0
libtpu: 0.0.40
codegen_flags: <defaults>
</compile_context>

<pallas_src>
from functools import partial

import jax
import jax.numpy as jnp
import numpy as np
from jax.experimental import pallas as pl
from jax.experimental.pallas import tpu as pltpu


# ---------------------------------------------------------------------------
# Kernel
# ---------------------------------------------------------------------------
def _torgb_kernel(wmod_ref, x_ref, cb_ref, o_ref, *, conv_clamp):
    """One (batch block, spatial tile) program.

    wmod_ref: (BB, C_out, C_in)  per-batch modulated 1x1 conv weight
    x_ref   : (BB, C_in, T)      activation tile, HW on the lane axis
    cb_ref  : (C_out, 1)         conv bias
    o_ref   : (BB, C_out, T)     output tile (lane-dense)
    """
    out = jnp.einsum('boi,bis->bos', wmod_ref[...], x_ref[...],
                     preferred_element_type=jnp.float32)        # (BB, C_out, T)
    out = out + cb_ref[...]                                     # (C_out,1) broadcast
    if conv_clamp is not None:
        c = float(conv_clamp)
        out = jnp.clip(out, -c, c)
    o_ref[...] = out.astype(o_ref.dtype)


# ---------------------------------------------------------------------------
# Tiling / VMEM budgeting
# ---------------------------------------------------------------------------
def _vmem_caps():
    """(scoped vmem_limit cap, tile working-set budget) per chip generation."""
    try:
        cap = int(pltpu.get_tpu_info().vmem_capacity_bytes)
    except Exception:
        cap = 128 * 1024 * 1024
    if cap <= 64 * 1024 * 1024:            # v7x: 64 MiB physical per TensorCore
        limit = 48 * 1024 * 1024
    else:                                   # v5e / v6e: 128 MiB physical
        limit = 100 * 1024 * 1024
    return limit, int(0.8 * limit)


def _choose_tiling(B, C_in, C_out, HW, itemsize, tile_budget, max_cols=131072):
    """Pick (T, n_tiles, BB): spatial tile, #spatial tiles, batch block."""
    # Columns that fit the double-buffered (x + out) working set per batch elem.
    per_col = 2 * (C_in + C_out) * itemsize
    t_cap = max(128, (tile_budget // per_col) // 128 * 128)
    t_cap = min(t_cap, max_cols)

    if HW <= t_cap:
        T, n_tiles = HW, 1
    else:
        T = 0
        if HW % 128 == 0:
            t = t_cap
            while t >= 128:                 # largest 128-multiple divisor <= budget
                if HW % t == 0:
                    T = t
                    break
                t -= 128
        if T == 0:
            # No nice divisor: partial last tile (Pallas masks OOB writeback).
            T = t_cap
        n_tiles = pl.cdiv(HW, T)

    # Batch blocking only helps when the whole spatial extent fits one tile
    # (low StyleGAN resolutions) — merge grid steps to amortize step overhead,
    # but keep >= 2 grid steps when B >= 2 so both v7x TensorCores get work.
    BB = 1
    if n_tiles == 1 and B > 1:
        per_batch = max(1, 2 * (C_in + C_out) * T * itemsize)
        bb_cap = max(1, tile_budget // per_batch)
        bb_cap = min(bb_cap, max(1, B // 2))
        for bb in range(min(bb_cap, B), 0, -1):
            if B % bb == 0:
                BB = bb
                break
    return T, n_tiles, BB


# ---------------------------------------------------------------------------
# Wrapper
# ---------------------------------------------------------------------------
def to_rgb_forward(x_nchw, w, params, conv_clamp=None):
    """x_nchw: [B, C_in, H, W], w: [B, w_dim]  ->  [B, C_out, H, W]."""
    B, C_in, H, W = x_nchw.shape
    w_dim = w.shape[1]

    fc_w = params["fc_weight"]          # [3*C_in, w_dim]
    fc_b = params["fc_bias"]            # [3*C_in]
    conv_w = params["conv_weight"]      # [C_out, C_in, 1, 1]
    conv_b = params["conv_bias"]        # [C_out]
    C_out = conv_w.shape[0]

    # --- StyleSplit / FC and modulation hoisted to XLA (tiny, MXU-friendly) ---
    fc_gain = 1.0 / np.sqrt(w_dim)               # FullyConnectedLayer weight gain
    style_gain = 1.0 / np.sqrt(C_in * 1 * 1)     # ToRGBLayer weight_gain (k=1)
    y = jnp.dot(w.astype(jnp.float32), fc_w.T * fc_gain) + fc_b[None, :]
    m1, m2, m3 = jnp.split(y, 3, axis=1)
    styles = (m1 * m2 + m3) * style_gain                                # (B, C_in)
    # demodulate=False modulated 1x1 conv == fold styles into the weight.
    wmod = (conv_w[None, :, :, 0, 0].astype(jnp.float32)
            * styles[:, None, :]).astype(x_nchw.dtype)                  # (B, C_out, C_in)
    cb = conv_b.reshape(C_out, 1).astype(jnp.float32)                   # (C_out, 1)

    # --- NCHW kept; flatten spatial only (pure reshape, no transpose) ---
    HW = H * W
    x_flat = x_nchw.reshape(B, C_in, HW)

    itemsize = np.dtype(x_nchw.dtype).itemsize
    vmem_limit_cap, tile_budget = _vmem_caps()
    T, n_tiles, BB = _choose_tiling(B, C_in, C_out, HW, itemsize, tile_budget)

    # Scoped VMEM: double-buffered x/out tiles + the small per-step params.
    working = 2 * BB * (C_in + C_out) * T * itemsize
    working += 2 * (BB * C_out * C_in * itemsize + C_out * 4)
    vmem_limit = int(min(max(int(1.5 * working) + (4 << 20), 16 << 20),
                         vmem_limit_cap))

    grid = (B // BB, n_tiles)

    out_flat = pl.pallas_call(
        partial(_torgb_kernel, conv_clamp=conv_clamp),
        out_shape=jax.ShapeDtypeStruct((B, C_out, HW), x_nchw.dtype),
        grid=grid,
        in_specs=[
            pl.BlockSpec((BB, C_out, C_in), lambda b, t: (b, 0, 0)),   # wmod
            pl.BlockSpec((BB, C_in, T), lambda b, t: (b, 0, t)),       # x tile
            pl.BlockSpec((C_out, 1), lambda b, t: (0, 0)),             # bias
        ],
        out_specs=pl.BlockSpec((BB, C_out, T), lambda b, t: (b, 0, t)),
        compiler_params=pltpu.CompilerParams(
            dimension_semantics=("parallel", "parallel"),
            vmem_limit_bytes=vmem_limit),
    )(wmod, x_flat, cb)

    return out_flat.reshape(B, C_out, H, W)


# ---------------------------------------------------------------------------
# Pure-JAX reference (mirrors the PyTorch module)
# ---------------------------------------------------------------------------
def to_rgb_reference(x_nchw, w, params, conv_clamp=None):
    B, C_in, H, W = x_nchw.shape
    w_dim = w.shape[1]
    fc_w, fc_b = params["fc_weight"], params["fc_bias"]
    conv_w, conv_b = params["conv_weight"], params["conv_bias"]

    y = w @ (fc_w.T * (1.0 / np.sqrt(w_dim))) + fc_b[None, :]
    m1, m2, m3 = jnp.split(y, 3, axis=1)
    styles = (m1 * m2 + m3) * (1.0 / np.sqrt(C_in))
    wmod = conv_w[None, :, :, 0, 0] * styles[:, None, :]          # [B, C_out, C_in]
    out = jnp.einsum('boi,bihw->bohw', wmod, x_nchw) + conv_b[None, :, None, None]
    if conv_clamp is not None:
        out = jnp.clip(out, -conv_clamp, conv_clamp)
    return out


def init_params(key, in_channels, out_channels, w_dim, kernel_size=1):
    k1, k2 = jax.random.split(key)
    return {
        # FullyConnectedLayer(w_dim, 3*in_channels, bias_init=1)
        "fc_weight": jax.random.normal(k1, (3 * in_channels, w_dim), jnp.float32),
        "fc_bias": jnp.ones((3 * in_channels,), jnp.float32),
        # ToRGBLayer.weight = 0.1 * randn([out, in, k, k])
        "conv_weight": 0.1 * jax.random.normal(
            k2, (out_channels, in_channels, kernel_size, kernel_size), jnp.float32),
        # ToRGBLayer.bias = zeros([out])
        "conv_bias": jnp.zeros((out_channels,), jnp.float32),
    }


if __name__ == "__main__":
    B, C_in, C_out, W_DIM, H, W = 2, 16, 3, 32, 16, 16

    key = jax.random.PRNGKey(0)
    kx, kw, kp = jax.random.split(key, 3)
    x = jax.random.normal(kx, (B, C_in, H, W), jnp.float32)   # NCHW, like PyTorch
    wlat = jax.random.normal(kw, (B, W_DIM), jnp.float32)
    params = init_params(kp, C_in, C_out, W_DIM, kernel_size=1)

    # Unclamped path (ToRGB default) and the conv_clamp=256 path used by
    # SynthesisBlock — both checked against the pure-JAX reference.
    out = jax.block_until_ready(to_rgb_forward(x, wlat, params, conv_clamp=None))
    ref = to_rgb_reference(x, wlat, params, conv_clamp=None)
    assert out.shape == (B, C_out, H, W), out.shape
    np.testing.assert_allclose(np.asarray(out), np.asarray(ref), rtol=1e-5, atol=1e-5)

    out_c = jax.block_until_ready(to_rgb_forward(x, wlat, params, conv_clamp=256))
    ref_c = to_rgb_reference(x, wlat, params, conv_clamp=256)
    np.testing.assert_allclose(np.asarray(out_c), np.asarray(ref_c), rtol=1e-5, atol=1e-5)

    print("KERNEL_OK")
</pallas_src>

<mosaic_0001>
module attributes {stable_mosaic.version = 11 : i64} {
  func.func @_torgb_kernel(%arg0: i32, %arg1: i32, %arg2: memref<1x3x16xf32, #tpu.memory_space<vmem>>, %arg3: memref<1x16x256xf32, #tpu.memory_space<vmem>>, %arg4: memref<3x1xf32, #tpu.memory_space<vmem>>, %arg5: memref<1x3x256xf32, #tpu.memory_space<vmem>>) attributes {dimension_semantics = [#tpu.dimension_semantics<parallel>, #tpu.dimension_semantics<parallel>], iteration_bounds = array<i64: 2, 1>, scalar_prefetch = 0 : i64, scratch_operands = 0 : i64, tpu.core_type = #tpu.core_type<tc>, window_params = [{transform_indices = @transform_0, window_bounds = array<i64: 1, 3, 16>}, {transform_indices = @transform_1, window_bounds = array<i64: 1, 16, 256>}, {pipeline_mode = #tpu.pipeline_mode<synchronous>, transform_indices = @transform_2, window_bounds = array<i64: 3, 1>}, {transform_indices = @transform_3, window_bounds = array<i64: 1, 3, 256>}]} {
    %c0 = arith.constant 0 : index
    %c0_0 = arith.constant 0 : index
    %c0_1 = arith.constant 0 : index
    %0 = vector.load %arg2[%c0, %c0_0, %c0_1] : memref<1x3x16xf32, #tpu.memory_space<vmem>>, vector<1x3x16xf32>
    %c0_2 = arith.constant 0 : index
    %c0_3 = arith.constant 0 : index
    %c0_4 = arith.constant 0 : index
    %1 = vector.load %arg3[%c0_2, %c0_3, %c0_4] : memref<1x16x256xf32, #tpu.memory_space<vmem>>, vector<1x16x256xf32>
    "tpu.trace_start"() <{level = 10 : i32, message = "boi,bis->bos"}> : () -> ()
    %cst = arith.constant dense<0.000000e+00> : vector<1x3x256xf32>
    %2 = tpu.matmul %0, %1, %cst {dimension_numbers = #tpu.dot_dimension_numbers<[2], [1], [1], [2], [0, 0, 0, 1, 1, 2], [0], [0]>} : vector<1x3x16xf32>, vector<1x16x256xf32>, vector<1x3x256xf32> -> vector<1x3x256xf32>
    "tpu.trace_stop"() : () -> ()
    %c0_5 = arith.constant 0 : index
    %c0_6 = arith.constant 0 : index
    %3 = vector.load %arg4[%c0_5, %c0_6] : memref<3x1xf32, #tpu.memory_space<vmem>>, vector<3x1xf32>
    %4 = vector.shape_cast %3 : vector<3x1xf32> to vector<1x3x1xf32>
    %5 = vector.broadcast %4 : vector<1x3x1xf32> to vector<1x3x256xf32>
    %6 = arith.addf %2, %5 : vector<1x3x256xf32>
    %c0_7 = arith.constant 0 : index
    %c0_8 = arith.constant 0 : index
    %c0_9 = arith.constant 0 : index
    %7 = vector.load %arg5[%c0_7, %c0_8, %c0_9] : memref<1x3x256xf32, #tpu.memory_space<vmem>>, vector<1x3x256xf32>
    tpu.vector_store %arg5[%c0_7, %c0_8, %c0_9], %6 {strides = array<i32>} : memref<1x3x256xf32, #tpu.memory_space<vmem>>, vector<1x3x256xf32>,
    return
  }
  func.func @transform_0(%arg0: i32, %arg1: i32) -> (i32, i32, i32) {
    %c0_i32 = arith.constant 0 : i32
    %c0_i32_0 = arith.constant 0 : i32
    %c0_i32_1 = arith.constant 0 : i32
    return %arg0, %c0_i32, %c0_i32_0 : i32, i32, i32
  }
  func.func @transform_1(%arg0: i32, %arg1: i32) -> (i32, i32, i32) {
    %c0_i32 = arith.constant 0 : i32
    %c0_i32_0 = arith.constant 0 : i32
    return %arg0, %c0_i32, %arg1 : i32, i32, i32
  }
  func.func @transform_2(%arg0: i32, %arg1: i32) -> (i32, i32) {
    %c0_i32 = arith.constant 0 : i32
    %c0_i32_0 = arith.constant 0 : i32
    %c0_i32_1 = arith.constant 0 : i32
    return %c0_i32, %c0_i32_0 : i32, i32
  }
  func.func @transform_3(%arg0: i32, %arg1: i32) -> (i32, i32, i32) {
    %c0_i32 = arith.constant 0 : i32
    %c0_i32_0 = arith.constant 0 : i32
    return %arg0, %c0_i32, %arg1 : i32, i32, i32
  }
}

</mosaic_0001>

<bundles_post_ra>
// kernel: tpu_custom_call.1
= control target key start
LH: loop header
LB: loop body
LE: loop exit
PB: predicated region body
PF: predicated region fallthrough
CT: control target
= control target key end

     0   :  { %8 = vsyncpa [#allocation3], 0  ;;  %s752_s0 = inlined_call_operand.vmem [shape: f32[2,3,16], index: 0, kind: input, shape index: {}]   ;;  %s753_s1 = inlined_call_operand.hbm [shape: f32[2,16,256], index: 1, kind: input, shape index: {}]   ;;  %s754_s2 = inlined_call_operand.vmem [shape: f32[3,1], index: 2, kind: input, shape index: {}]   ;;  %s755_s3 = inlined_call_operand.vmem [shape: f32[2,3,256], index: 3, kind: output, shape index: {}]  }
   0x1   :  { %10 = vsyncpa [#allocation3 + $0x1], 0  ;;  %s622_s12 = smov 0   ;;  %s624_s13 = smov 0  }
   0x2   :  { %s626_s14 = smov 0   ;;  %s628_s15 = smov 0  }
   0x3   :  { %s630_s16 = smov 0   ;;  %s632_s17 = smov 0  }
   0x4 LB: > { %s434_s18 = sadd.s32 4294967295, %s595_s17   ;;  %s28_s19 = sadd.s32 1, %s591_s16  ;;  %s595_s17 = sphi %s632_s17, %s16_s17   ;;  %s591_s16 = sphi %s630_s16, %s763_s16   ;;  %s587_s15 = sphi %s628_s15, %s762_s15   ;;  %s583_s14 = sphi %s626_s14, %s761_s14   ;;  %s579_s13 = sphi %s624_s13, %s760_s13   ;;  %s575_s12 = sphi %s622_s12, %s759_s12  }
   0x5   : > { %p30_p0 = scmp.ge.s32.totalorder %s28_s19, 2  ;;  %s63_s20 = sadd.s32 1, %s583_s14 }
   0x6   : > { %p70_p1 = scmp.ne.s32.totalorder %s583_s14, %s579_s13  ;;  %p71_p2 = scmp.eq.s32.totalorder %s595_s17, 0 }
   0x7   : > { %s765_s19 = smov (%p30_p0, %s28_s19), 0  ;;  %p76_p4 = scmp.ne.s32.totalorder %s579_s13, %s575_s12 }
   0x8   : > { %p658_p3 = por %p71_p2, %p70_p1  ;;  %s58_s22 = ssub.s32 %s591_s16, %s765_s19 }
   0x9   : > { %p77_p5 = scmp.eq.s32.totalorder %s434_s18, 0  ;;  %p61_p6 = scmp.eq.s32.totalorder %s58_s22, 0 }
   0xa   : > { %p461_p8 = scmp.lt.s32.totalorder %s595_s17, 2  ;;  %s159_s25 = sand.u32 1, %s583_s14  }
   0xb   : > { %p665_p7 = por %p77_p5, %p76_p4  ;;  %s449_s26 = sshll.u32 %s591_s16, 9 }
   0xc   : > { %s671_s24 = scalar_select %p61_p6, %s583_s14, %s63_s20  }
   0xd   : > { %s438_s27 = sshll.u32 %s159_s25, 5  ;;  %s678_s30 = scalar_lea.hbm %s753_s1, %s449_s26 }
   0xe   : > { %s163_s4 = scalar_lea.vmem [#allocation2], %s438_s27  ;;  %p682_p9 = pnand %p461_p8, %p658_p3 }
   0xf   : > { %s172_s5 = sshll.u32 %s163_s4, 4  ;;  %s688_s7 = scalar_lea.sflag [#allocation3], %s159_s25  ;;  %s686_s5 = int_to_ptr.vmem [resolvable:$true] %s172_s5 }
  0x10   : > { %s515_s8 = scalar_lea.hbm %s678_s30, 512  ;;  %p517_p11 = pneg %p682_p9 }
  0x11   : > { %p516_p10 = scmp.ne.s32.totalorder %s678_s30, %s515_s8  ;;  %s520_s11 = scalar_lea.hbm %s753_s1, 1024 }
  0x12   : > { %p521_p0 = scmp.lt.u32.totalorder %s678_s30, %s753_s1  ;;  %p522_p1 = scmp.lt.u32.totalorder %s520_s11, %s515_s8 }
  0x13   : > { %p518_p12 = pnand %p517_p11, %p516_p10  ;;  %p524_p3 = scmp.lt.u32.totalorder %s515_s8, %s678_s30 }
  0x14   : > { %p523_p2 = por %p522_p1, %p521_p0 }
  0x15   : > { %p519_p13 = pneg %p518_p12 }
  0x16   : > { %p525_p4 = por %p524_p3, %p523_p2 }
  0x18   : > { %p526_p5 = pnand %p525_p4, %p519_p13 }
  0x1a   : > { %529 = shalt.err (!%p526_p5)
}
  0x1b   : > { %s530_s20 = scalar_lea.vmem %s686_s5, 512  ;;  %s597_s21 = smov [#allocation2]  }
  0x1c   : > { %p531_p6 = scmp.ne.s32.totalorder %s686_s5, %s530_s20  ;;  %s535_s22 = sshll.u32 %s597_s21, 4  ;;  %s536_s22 = int_to_ptr.vmem [resolvable:$false] %s535_s22 }
  0x1d   : > { %s537_s25 = scalar_lea.vmem %s536_s22, 1024  ;;  %p538_p12 = scmp.lt.s32.totalorder %s686_s5, %s536_s22 }
  0x1e   : > { %p533_p8 = pnand %p531_p6, %p517_p11  ;;  %p539_p0 = scmp.lt.s32.totalorder %s537_s25, %s530_s20 }
  0x20   : > { %p534_p10 = pneg %p533_p8  ;;  %p540_p1 = por %p539_p0, %p538_p12 }
  0x22   : > { %p541_p2 = pnand %p540_p1, %p534_p10 }
  0x24   : > { %544 = shalt.err (!%p541_p2)
}
  0x25   : > { %s598_s26 = smov 256   ;;  %s599_s27 = smov 16  }
  0x26   : > { %460 = dma.hbm_to_vmem [thread:$0]  (!%p682_p9), %s678_s30, 512, %s686_s5, %s688_s7, %s598_s26, %s598_s26, %s599_s27  }
  0x27   : > { %p441_p11 = scmp.ge.s32.totalorder %s595_s17, 1  ;;  %p180_p13 = scmp.lt.s32.totalorder %s595_s17, 3 }
  0x29   : > { %p181_p3 = pnand %p441_p11, %p180_p13 }
  0x2a   : > { %s186_s28 = sand.u32 (!%p181_p3), 1, %s579_s13  }
  0x2b   : > { %184 = sbr.rel (%p181_p3) target bundleno = 276 (0x114), region = 32  ;;  %s442_s29 = sshll.u32 (!%p181_p3), %s186_s28, 5 }
  0x2c   : > { %s187_s4 = scalar_lea.sflag (!%p181_p3), [#allocation3], %s186_s28  ;;  %s190_s8 = scalar_lea.vmem (!%p181_p3), [#allocation2], %s442_s29 }
  0x32   : > { %570 = dma.done.wait (%p665_p7), %s187_s4, 512  }
  0x33   : > { %572 = vsyncadd (%p665_p7), %s187_s4, 4294966784  ;;  %p221_p4 = scmp.lt.s32.totalorder %s587_s15, 1  ;;  %v600_v0 = vmov 0.0   ;;  %v601_v1 = vmov 0   ;;  %v238_v2 = vld [vmem:[%s190_s8 + $0x8] sm:$0xff]  ;;  %v240_v3 = vld [vmem:[%s190_s8 + $0x18] sm:$0xff] }
  0x34   : > { %315 = vmatprep.mubr.f32.mxu0 %v600_v0  ;;  %514 = vset.pattern.permute.xlu0 %v601_v1  ;;  %v237_v4 = vld [vmem:[%s190_s8] sm:$0xff]  ;;  %v451_v5 = vpack.c.bf16 %v240_v3, %v238_v2  ;;  %v239_v6 = vld [vmem:[%s190_s8 + $0x10] sm:$0xff]  ;;  %vm247_vm0 = vcmask 130048  }
  0x35   : > { %s767_s15 = smov (!%p221_p4, %s587_s15), 1  ;;  %v241_v7 = vld [vmem:[%s754_s2] sm:$0x7]  ;;  %v453_v8 = vpack.c.bf16 %v239_v6, %v237_v4 }
  0x36   : > { %s443_s30 = sshll.u32 %s767_s15, 2  ;;  %244 = vperm.xlu0 %514, %v241_v7   ;;  %452 = vmatprep.subr.bf16.mxu0 %v451_v5  ;;  %s450_s10 = sshll.u32 %s767_s15, 3 }
  0x37   : > { %s224_s7 = scalar_lea.vmem %s752_s0, %s443_s30  ;;  %454 = vmatpush1.bf16.msra.mxu0 %v453_v8  ;;  %s234_s18 = scalar_lea.vmem %s755_s3, %s450_s10 }
  0x38   : > { %v236_v9 = vld [vmem:[%s224_s7] sm:$0x7] }
  0x3a   : > { %446 = vmatmul.mubr.msk.f32.vlgmr.msra.gmra.mrb[0].mxu0 %vm247_vm0, %v236_v9 }
  0xb5   : > { %v245_v10 = vpop.permute.xlu0 %244 }
 0x10d   : > { %v317_v11 = vpop.f32.mrb[0].mxu0 }
 0x10e   : > { %v318_v12 = vadd.f32 %v317_v11, %v245_v10  ;;  %v319_v13 = vpop.f32.mrb[1].mxu0 }
 0x10f   : > { %v320_v14 = vadd.f32 %v319_v13, %v245_v10 }
 0x111   : > { %v324_v15 = vcombine.low %v318_v12, %v320_v14 }
 0x113   : > { %326 = vst [vmem:[%s234_s18] sm:$0x77] %v324_v15 }
 0x114 PF: > { %s16_s17 = sadd.s32 1, %s595_s17   ;;  %s759_s12 = smov %s579_s13 }
 0x115   : > { %p13_p7 = scmp.ge.s32.totalorder %s16_s17, 4   ;;  %s760_s13 = smov %s583_s14 }
 0x116   : > { %s761_s14 = smov %s671_s24  ;;  %s762_s15 = smov %s591_s16 }
 0x117   : > { %s763_s16 = smov %s765_s19  ;;  %15 = sbr.rel (!%p13_p7) target bundleno = 4 (0x4), region = 75 }
 0x11e   :  { %357 = vsyncpa [#allocation3], 1 }
 0x11f   :  { %359 = vsyncpa [#allocation3 + $0x1], 1 }

</bundles_post_ra>
